<compile_context>
chip_gen: v5e
topology: v5e:2x2
jax: 0.10.0
libtpu: 0.0.40
codegen_flags: <defaults>
</compile_context>

<pallas_src>
import functools

import jax
import jax.numpy as jnp
from jax.experimental import pallas as pl
from jax.experimental.pallas import tpu as pltpu

LANE = 128      # vreg lane width
SUBLANE = 8     # vreg sublane count


def _round_up(n, m):
    return ((n + m - 1) // m) * m


# --------------------------------------------------------------------------
# Kernel: fused 5-layer MLP on one batch tile.  All hidden feature dims are
# pre-padded to multiples of 128; the final matmul emits [out | h4] packed.
# --------------------------------------------------------------------------
def _mlp_kernel(x_ref,
                w1_ref, b1_ref, w2_ref, b2_ref, w3_ref, b3_ref,
                w4_ref, b4_ref, w5c_ref, b5c_ref,
                out_ref, *, relu_out: bool):
    cdt = w1_ref.dtype  # compute dtype for MXU inputs (bf16 by default)

    h = jnp.dot(x_ref[...].astype(cdt), w1_ref[...],
                preferred_element_type=jnp.float32) + b1_ref[...]
    h = jnp.maximum(h, 0.0)
    # dropout(p=0.0) -> identity
    h = jnp.dot(h.astype(cdt), w2_ref[...],
                preferred_element_type=jnp.float32) + b2_ref[...]
    h = jnp.maximum(h, 0.0)
    h = jnp.dot(h.astype(cdt), w3_ref[...],
                preferred_element_type=jnp.float32) + b3_ref[...]
    h = jnp.maximum(h, 0.0)
    h4 = jnp.dot(h.astype(cdt), w4_ref[...],
                 preferred_element_type=jnp.float32) + b4_ref[...]
    h4 = jnp.maximum(h4, 0.0)

    # Fused output layer: w5c = [W5 | I_h4] (zero-padded) so one matmul
    # produces the packed slab [out | h4 | zeros].
    comb = jnp.dot(h4.astype(cdt), w5c_ref[...],
                   preferred_element_type=jnp.float32) + b5c_ref[...]
    if relu_out:
        comb = jnp.maximum(comb, 0.0)   # safe: h4 columns are already >= 0
    out_ref[...] = comb


# --------------------------------------------------------------------------
# Parameter helpers
# --------------------------------------------------------------------------
def init_params(key, input_size, hidden_sizes, output_size):
    """Deterministic synthetic parameters (Kaiming-uniform-ish like nn.Linear).

    Weights are stored (in_features, out_features) so x @ W + b matches
    PyTorch's x @ W.T + b.
    """
    h1, h2, h3, h4 = hidden_sizes
    dims = [input_size, h1, h2, h3, h4, output_size]
    keys = jax.random.split(key, 2 * (len(dims) - 1))

    params = []
    for li, (fan_in, fan_out) in enumerate(zip(dims[:-1], dims[1:])):
        bound = 1.0 / jnp.sqrt(jnp.float32(fan_in))
        w = jax.random.uniform(keys[2 * li], (fan_in, fan_out), jnp.float32, -bound, bound)
        b = jax.random.uniform(keys[2 * li + 1], (1, fan_out), jnp.float32, -bound, bound)
        params += [w, b]
    return tuple(params)


def pack_params(params, compute_dtype=jnp.bfloat16):
    """One-time padding / packing of parameters for the kernel.

    * Hidden feature dims zero-padded to multiples of 128 (exact: padded
      rows/cols and biases are zero, relu(0)=0).
    * w1 keeps its TRUE input dim (x is never padded).
    * Output layer fused with an identity projection of hidden4 so the kernel
      writes a single packed [out | h4] slab.
    * Weights cast to `compute_dtype` (bf16); biases stay f32 (added to the
      f32 accumulator).
    """
    w1, b1, w2, b2, w3, b3, w4, b4, w5, b5 = params
    h4_size, output_size = w5.shape

    def pad_w(w, pad_in=True):
        kin, kout = w.shape
        kin_p = _round_up(kin, LANE) if pad_in else kin
        kout_p = _round_up(kout, LANE)
        wp = jnp.zeros((kin_p, kout_p), jnp.float32).at[:kin, :kout].set(w)
        return wp.astype(compute_dtype)

    def pad_b(b):
        kout = b.shape[-1]
        kout_p = _round_up(kout, LANE)
        return jnp.zeros((1, kout_p), jnp.float32).at[:, :kout].set(b.reshape(1, -1))

    w1p = pad_w(w1, pad_in=False)          # true in_features on the K dim
    w2p, w3p, w4p = pad_w(w2), pad_w(w3), pad_w(w4)
    b1p, b2p, b3p, b4p = pad_b(b1), pad_b(b2), pad_b(b3), pad_b(b4)

    h4_p = _round_up(h4_size, LANE)
    comb_p = _round_up(output_size + h4_size, LANE)
    w5c = jnp.zeros((h4_p, comb_p), jnp.float32)
    w5c = w5c.at[:h4_size, :output_size].set(w5)
    w5c = w5c.at[:h4_size, output_size:output_size + h4_size].set(
        jnp.eye(h4_size, dtype=jnp.float32))
    w5c = w5c.astype(compute_dtype)
    b5c = jnp.zeros((1, comb_p), jnp.float32).at[:, :output_size].set(b5.reshape(1, -1))

    return (w1p, b1p, w2p, b2p, w3p, b3p, w4p, b4p, w5c, b5c)


# --------------------------------------------------------------------------
# Wrapper
# --------------------------------------------------------------------------
def objective_estimator_forward(x, packed_params, *, output_size, h4_size,
                                relu_out=False, tile_b=None):
    """Fused MLP forward. Returns (output[batch, output_size], hidden4[batch, h4_size])."""
    (w1, b1, w2, b2, w3, b3, w4, b4, w5c, b5c) = packed_params

    batch, in_features = x.shape
    assert w1.shape[0] == in_features, "w1 input dim must equal x feature dim"
    h1p, h2p, h3p, h4p = w1.shape[1], w2.shape[1], w3.shape[1], w4.shape[1]
    comb_p = w5c.shape[1]

    # Batch tile: multiple of 8 sublanes; fat tiles (cap 1024 rows) amortize
    # the ~0.35 us/step pipeline overhead, while aiming for >=2 grid steps so
    # both v7x TensorCores get work on large batches.
    if tile_b is None:
        tile_b = min(1024, _round_up(pl.cdiv(batch, 2), SUBLANE))
    tile_b = max(SUBLANE, _round_up(int(tile_b), SUBLANE))

    grid = (pl.cdiv(batch, tile_b),)
    kernel = functools.partial(_mlp_kernel, relu_out=relu_out)

    def act_spec(feat):
        return pl.BlockSpec((tile_b, feat), lambda i: (i, 0))

    def pinned_spec(arr):
        # Constant index_map: block never changes -> stays VMEM-resident
        # across all grid iterations (no per-step weight DMA).
        return pl.BlockSpec(arr.shape, lambda i: (0, 0))

    param_bytes = sum(int(p.size) * p.dtype.itemsize for p in packed_params)
    flops = 2 * batch * (in_features * h1p + h1p * h2p + h2p * h3p
                         + h3p * h4p + h4p * comb_p)
    bytes_accessed = (int(x.size) * x.dtype.itemsize + param_bytes
                      + batch * comb_p * 4)

    comb = pl.pallas_call(
        kernel,
        out_shape=jax.ShapeDtypeStruct((batch, comb_p), jnp.float32),
        grid=grid,
        in_specs=[
            act_spec(in_features),
            pinned_spec(w1), pinned_spec(b1),
            pinned_spec(w2), pinned_spec(b2),
            pinned_spec(w3), pinned_spec(b3),
            pinned_spec(w4), pinned_spec(b4),
            pinned_spec(w5c), pinned_spec(b5c),
        ],
        out_specs=act_spec(comb_p),
        compiler_params=pltpu.CompilerParams(
            dimension_semantics=("parallel",),
            vmem_limit_bytes=32 * 1024 * 1024),
        cost_estimate=pl.CostEstimate(
            flops=int(flops), transcendentals=0,
            bytes_accessed=int(bytes_accessed)),
    )(x, w1, b1, w2, b2, w3, b3, w4, b4, w5c, b5c)

    out = comb[:, :output_size]
    h4 = comb[:, output_size:output_size + h4_size]
    return out, h4


# --------------------------------------------------------------------------
# Plain-JAX reference matching the PyTorch module semantics (f32)
# --------------------------------------------------------------------------
def reference_forward(x, params, relu_out=False):
    w1, b1, w2, b2, w3, b3, w4, b4, w5, b5 = params
    h1 = jnp.maximum(x @ w1 + b1, 0.0)
    h2 = jnp.maximum(h1 @ w2 + b2, 0.0)
    h3 = jnp.maximum(h2 @ w3 + b3, 0.0)
    h4 = jnp.maximum(h3 @ w4 + b4, 0.0)
    out = h4 @ w5 + b5
    if relu_out:
        out = jnp.maximum(out, 0.0)
    return out, h4


if __name__ == "__main__":
    key = jax.random.PRNGKey(0)
    k_x, k_p = jax.random.split(key)

    batch = 8
    input_size = 16
    hidden_sizes = (32, 32, 32, 32)
    output_size = 8
    relu_out = False  # matches module default

    x = jax.random.normal(k_x, (batch, input_size), dtype=jnp.float32)
    params = init_params(k_p, input_size, hidden_sizes, output_size)
    packed_params = pack_params(params)  # done once, not per forward call

    fwd = jax.jit(functools.partial(
        objective_estimator_forward,
        output_size=output_size, h4_size=hidden_sizes[3], relu_out=relu_out))
    out, h4 = jax.block_until_ready(fwd(x, packed_params))

    ref_out, ref_h4 = reference_forward(x, params, relu_out=relu_out)
    assert out.shape == (batch, output_size)
    assert h4.shape == (batch, hidden_sizes[3])
    # bf16 MXU inputs with f32 accumulation -> relaxed tolerance vs f32 ref.
    assert jnp.allclose(out, ref_out, atol=5e-2, rtol=5e-2)
    assert jnp.allclose(h4, ref_h4, atol=5e-2, rtol=5e-2)

    print("KERNEL_OK")
</pallas_src>

<mosaic_0001>
module attributes {stable_mosaic.version = 11 : i64} {
  func.func @_mlp_kernel(%arg0: i32, %arg1: memref<8x16xf32, #tpu.memory_space<vmem>>, %arg2: memref<16x128xbf16, #tpu.memory_space<vmem>>, %arg3: memref<1x128xf32, #tpu.memory_space<vmem>>, %arg4: memref<128x128xbf16, #tpu.memory_space<vmem>>, %arg5: memref<1x128xf32, #tpu.memory_space<vmem>>, %arg6: memref<128x128xbf16, #tpu.memory_space<vmem>>, %arg7: memref<1x128xf32, #tpu.memory_space<vmem>>, %arg8: memref<128x128xbf16, #tpu.memory_space<vmem>>, %arg9: memref<1x128xf32, #tpu.memory_space<vmem>>, %arg10: memref<128x128xbf16, #tpu.memory_space<vmem>>, %arg11: memref<1x128xf32, #tpu.memory_space<vmem>>, %arg12: memref<8x128xf32, #tpu.memory_space<vmem>>) attributes {dimension_semantics = [#tpu.dimension_semantics<parallel>], iteration_bounds = array<i64: 1>, scalar_prefetch = 0 : i64, scratch_operands = 0 : i64, tpu.core_type = #tpu.core_type<tc>, window_params = [{transform_indices = @transform_0, window_bounds = array<i64: 8, 16>}, {pipeline_mode = #tpu.pipeline_mode<synchronous>, transform_indices = @transform_1, window_bounds = array<i64: 16, 128>}, {pipeline_mode = #tpu.pipeline_mode<synchronous>, transform_indices = @transform_2, window_bounds = array<i64: 1, 128>}, {pipeline_mode = #tpu.pipeline_mode<synchronous>, transform_indices = @transform_3, window_bounds = array<i64: 128, 128>}, {pipeline_mode = #tpu.pipeline_mode<synchronous>, transform_indices = @transform_4, window_bounds = array<i64: 1, 128>}, {pipeline_mode = #tpu.pipeline_mode<synchronous>, transform_indices = @transform_5, window_bounds = array<i64: 128, 128>}, {pipeline_mode = #tpu.pipeline_mode<synchronous>, transform_indices = @transform_6, window_bounds = array<i64: 1, 128>}, {pipeline_mode = #tpu.pipeline_mode<synchronous>, transform_indices = @transform_7, window_bounds = array<i64: 128, 128>}, {pipeline_mode = #tpu.pipeline_mode<synchronous>, transform_indices = @transform_8, window_bounds = array<i64: 1, 128>}, {pipeline_mode = #tpu.pipeline_mode<synchronous>, transform_indices = @transform_9, window_bounds = array<i64: 128, 128>}, {pipeline_mode = #tpu.pipeline_mode<synchronous>, transform_indices = @transform_10, window_bounds = array<i64: 1, 128>}, {transform_indices = @transform_11, window_bounds = array<i64: 8, 128>}]} {
    %c0 = arith.constant 0 : index
    %c0_0 = arith.constant 0 : index
    %0 = vector.load %arg1[%c0, %c0_0] : memref<8x16xf32, #tpu.memory_space<vmem>>, vector<8x16xf32>
    %1 = arith.truncf %0 : vector<8x16xf32> to vector<8x16xbf16>
    %c0_1 = arith.constant 0 : index
    %c0_2 = arith.constant 0 : index
    %2 = vector.load %arg2[%c0_1, %c0_2] : memref<16x128xbf16, #tpu.memory_space<vmem>>, vector<16x128xbf16>
    %cst = arith.constant dense<0.000000e+00> : vector<8x128xf32>
    %3 = tpu.matmul %1, %2, %cst {dimension_numbers = #tpu.dot_dimension_numbers<[1], [0], [0], [1], [0, 0, 1, 1], [], []>} : vector<8x16xbf16>, vector<16x128xbf16>, vector<8x128xf32> -> vector<8x128xf32>
    %c0_3 = arith.constant 0 : index
    %c0_4 = arith.constant 0 : index
    %4 = vector.load %arg3[%c0_3, %c0_4] : memref<1x128xf32, #tpu.memory_space<vmem>>, vector<1x128xf32>
    %5 = vector.broadcast %4 : vector<1x128xf32> to vector<8x128xf32>
    %6 = arith.addf %3, %5 : vector<8x128xf32>
    %cst_5 = arith.constant 0.000000e+00 : f32
    %7 = vector.broadcast %cst_5 : f32 to vector<8x128xf32>
    %8 = arith.maximumf %6, %7 : vector<8x128xf32>
    %9 = arith.truncf %8 : vector<8x128xf32> to vector<8x128xbf16>
    %c0_6 = arith.constant 0 : index
    %c0_7 = arith.constant 0 : index
    %10 = vector.load %arg4[%c0_6, %c0_7] : memref<128x128xbf16, #tpu.memory_space<vmem>>, vector<128x128xbf16>
    %cst_8 = arith.constant dense<0.000000e+00> : vector<8x128xf32>
    %11 = tpu.matmul %9, %10, %cst_8 {dimension_numbers = #tpu.dot_dimension_numbers<[1], [0], [0], [1], [0, 0, 1, 1], [], []>} : vector<8x128xbf16>, vector<128x128xbf16>, vector<8x128xf32> -> vector<8x128xf32>
    %c0_9 = arith.constant 0 : index
    %c0_10 = arith.constant 0 : index
    %12 = vector.load %arg5[%c0_9, %c0_10] : memref<1x128xf32, #tpu.memory_space<vmem>>, vector<1x128xf32>
    %13 = vector.broadcast %12 : vector<1x128xf32> to vector<8x128xf32>
    %14 = arith.addf %11, %13 : vector<8x128xf32>
    %cst_11 = arith.constant 0.000000e+00 : f32
    %15 = vector.broadcast %cst_11 : f32 to vector<8x128xf32>
    %16 = arith.maximumf %14, %15 : vector<8x128xf32>
    %17 = arith.truncf %16 : vector<8x128xf32> to vector<8x128xbf16>
    %c0_12 = arith.constant 0 : index
    %c0_13 = arith.constant 0 : index
    %18 = vector.load %arg6[%c0_12, %c0_13] : memref<128x128xbf16, #tpu.memory_space<vmem>>, vector<128x128xbf16>
    %cst_14 = arith.constant dense<0.000000e+00> : vector<8x128xf32>
    %19 = tpu.matmul %17, %18, %cst_14 {dimension_numbers = #tpu.dot_dimension_numbers<[1], [0], [0], [1], [0, 0, 1, 1], [], []>} : vector<8x128xbf16>, vector<128x128xbf16>, vector<8x128xf32> -> vector<8x128xf32>
    %c0_15 = arith.constant 0 : index
    %c0_16 = arith.constant 0 : index
    %20 = vector.load %arg7[%c0_15, %c0_16] : memref<1x128xf32, #tpu.memory_space<vmem>>, vector<1x128xf32>
    %21 = vector.broadcast %20 : vector<1x128xf32> to vector<8x128xf32>
    %22 = arith.addf %19, %21 : vector<8x128xf32>
    %cst_17 = arith.constant 0.000000e+00 : f32
    %23 = vector.broadcast %cst_17 : f32 to vector<8x128xf32>
    %24 = arith.maximumf %22, %23 : vector<8x128xf32>
    %25 = arith.truncf %24 : vector<8x128xf32> to vector<8x128xbf16>
    %c0_18 = arith.constant 0 : index
    %c0_19 = arith.constant 0 : index
    %26 = vector.load %arg8[%c0_18, %c0_19] : memref<128x128xbf16, #tpu.memory_space<vmem>>, vector<128x128xbf16>
    %cst_20 = arith.constant dense<0.000000e+00> : vector<8x128xf32>
    %27 = tpu.matmul %25, %26, %cst_20 {dimension_numbers = #tpu.dot_dimension_numbers<[1], [0], [0], [1], [0, 0, 1, 1], [], []>} : vector<8x128xbf16>, vector<128x128xbf16>, vector<8x128xf32> -> vector<8x128xf32>
    %c0_21 = arith.constant 0 : index
    %c0_22 = arith.constant 0 : index
    %28 = vector.load %arg9[%c0_21, %c0_22] : memref<1x128xf32, #tpu.memory_space<vmem>>, vector<1x128xf32>
    %29 = vector.broadcast %28 : vector<1x128xf32> to vector<8x128xf32>
    %30 = arith.addf %27, %29 : vector<8x128xf32>
    %cst_23 = arith.constant 0.000000e+00 : f32
    %31 = vector.broadcast %cst_23 : f32 to vector<8x128xf32>
    %32 = arith.maximumf %30, %31 : vector<8x128xf32>
    %33 = arith.truncf %32 : vector<8x128xf32> to vector<8x128xbf16>
    %c0_24 = arith.constant 0 : index
    %c0_25 = arith.constant 0 : index
    %34 = vector.load %arg10[%c0_24, %c0_25] : memref<128x128xbf16, #tpu.memory_space<vmem>>, vector<128x128xbf16>
    %cst_26 = arith.constant dense<0.000000e+00> : vector<8x128xf32>
    %35 = tpu.matmul %33, %34, %cst_26 {dimension_numbers = #tpu.dot_dimension_numbers<[1], [0], [0], [1], [0, 0, 1, 1], [], []>} : vector<8x128xbf16>, vector<128x128xbf16>, vector<8x128xf32> -> vector<8x128xf32>
    %c0_27 = arith.constant 0 : index
    %c0_28 = arith.constant 0 : index
    %36 = vector.load %arg11[%c0_27, %c0_28] : memref<1x128xf32, #tpu.memory_space<vmem>>, vector<1x128xf32>
    %37 = vector.broadcast %36 : vector<1x128xf32> to vector<8x128xf32>
    %38 = arith.addf %35, %37 : vector<8x128xf32>
    %c0_29 = arith.constant 0 : index
    %c0_30 = arith.constant 0 : index
    %39 = vector.load %arg12[%c0_29, %c0_30] : memref<8x128xf32, #tpu.memory_space<vmem>>, vector<8x128xf32>
    tpu.vector_store %arg12[%c0_29, %c0_30], %38 {strides = array<i32>} : memref<8x128xf32, #tpu.memory_space<vmem>>, vector<8x128xf32>,
    return
  }
  func.func @transform_0(%arg0: i32) -> (i32, i32) {
    %c0_i32 = arith.constant 0 : i32
    %c0_i32_0 = arith.constant 0 : i32
    return %arg0, %c0_i32 : i32, i32
  }
  func.func @transform_1(%arg0: i32) -> (i32, i32) {
    %c0_i32 = arith.constant 0 : i32
    %c0_i32_0 = arith.constant 0 : i32
    %c0_i32_1 = arith.constant 0 : i32
    return %c0_i32, %c0_i32_0 : i32, i32
  }
  func.func @transform_2(%arg0: i32) -> (i32, i32) {
    %c0_i32 = arith.constant 0 : i32
    %c0_i32_0 = arith.constant 0 : i32
    %c0_i32_1 = arith.constant 0 : i32
    return %c0_i32, %c0_i32_0 : i32, i32
  }
  func.func @transform_3(%arg0: i32) -> (i32, i32) {
    %c0_i32 = arith.constant 0 : i32
    %c0_i32_0 = arith.constant 0 : i32
    %c0_i32_1 = arith.constant 0 : i32
    return %c0_i32, %c0_i32_0 : i32, i32
  }
  func.func @transform_4(%arg0: i32) -> (i32, i32) {
    %c0_i32 = arith.constant 0 : i32
    %c0_i32_0 = arith.constant 0 : i32
    %c0_i32_1 = arith.constant 0 : i32
    return %c0_i32, %c0_i32_0 : i32, i32
  }
  func.func @transform_5(%arg0: i32) -> (i32, i32) {
    %c0_i32 = arith.constant 0 : i32
    %c0_i32_0 = arith.constant 0 : i32
    %c0_i32_1 = arith.constant 0 : i32
    return %c0_i32, %c0_i32_0 : i32, i32
  }
  func.func @transform_6(%arg0: i32) -> (i32, i32) {
    %c0_i32 = arith.constant 0 : i32
    %c0_i32_0 = arith.constant 0 : i32
    %c0_i32_1 = arith.constant 0 : i32
    return %c0_i32, %c0_i32_0 : i32, i32
  }
  func.func @transform_7(%arg0: i32) -> (i32, i32) {
    %c0_i32 = arith.constant 0 : i32
    %c0_i32_0 = arith.constant 0 : i32
    %c0_i32_1 = arith.constant 0 : i32
    return %c0_i32, %c0_i32_0 : i32, i32
  }
  func.func @transform_8(%arg0: i32) -> (i32, i32) {
    %c0_i32 = arith.constant 0 : i32
    %c0_i32_0 = arith.constant 0 : i32
    %c0_i32_1 = arith.constant 0 : i32
    return %c0_i32, %c0_i32_0 : i32, i32
  }
  func.func @transform_9(%arg0: i32) -> (i32, i32) {
    %c0_i32 = arith.constant 0 : i32
    %c0_i32_0 = arith.constant 0 : i32
    %c0_i32_1 = arith.constant 0 : i32
    return %c0_i32, %c0_i32_0 : i32, i32
  }
  func.func @transform_10(%arg0: i32) -> (i32, i32) {
    %c0_i32 = arith.constant 0 : i32
    %c0_i32_0 = arith.constant 0 : i32
    %c0_i32_1 = arith.constant 0 : i32
    return %c0_i32, %c0_i32_0 : i32, i32
  }
  func.func @transform_11(%arg0: i32) -> (i32, i32) {
    %c0_i32 = arith.constant 0 : i32
    %c0_i32_0 = arith.constant 0 : i32
    return %arg0, %c0_i32 : i32, i32
  }
}

</mosaic_0001>

<bundles_post_ra>
// kernel: objective_estimator_forward.1
= control target key start
LH: loop header
LB: loop body
LE: loop exit
PB: predicated region body
PF: predicated region fallthrough
CT: control target
= control target key end

     0   :  { %16 = vsyncpa [#allocation3], 0  ;;  %s953_s0 = inlined_call_operand.hbm [shape: f32[8,16], index: 0, kind: input, shape index: {}]   ;;  %s954_s1 = inlined_call_operand.hbm [shape: bf16[16,128], index: 1, kind: input, shape index: {}]   ;;  %s955_s2 = inlined_call_operand.vmem [shape: f32[1,128], index: 2, kind: input, shape index: {}]   ;;  %s956_s3 = inlined_call_operand.hbm [shape: bf16[128,128], index: 3, kind: input, shape index: {}]   ;;  %s957_s4 = inlined_call_operand.vmem [shape: f32[1,128], index: 4, kind: input, shape index: {}]   ;;  %s958_s5 = inlined_call_operand.hbm [shape: bf16[128,128], index: 5, kind: input, shape index: {}]   ;;  %s959_s6 = inlined_call_operand.vmem [shape: f32[1,128], index: 6, kind: input, shape index: {}]   ;;  %s960_s7 = inlined_call_operand.hbm [shape: bf16[128,128], index: 7, kind: input, shape index: {}]   ;;  %s961_s8 = inlined_call_operand.vmem [shape: f32[1,128], index: 8, kind: input, shape index: {}]   ;;  %s962_s9 = inlined_call_operand.hbm [shape: bf16[128,128], index: 9, kind: input, shape index: {}]   ;;  %s963_s10 = inlined_call_operand.vmem [shape: f32[1,128], index: 10, kind: input, shape index: {}]   ;;  %s964_s11 = inlined_call_operand.vmem [shape: f32[8,128], index: 11, kind: output, shape index: {}]  }
   0x1   :  { %17 = vsyncpa [#allocation5], 0 }
   0x2   :  { %18 = vsyncpa [#allocation8], 0  ;;  %s35_s19 = sshll.u32 %s954_s1, 4  ;;  %s36_s19 = int_to_ptr.hbm [resolvable:$true] %s35_s19 }
   0x3   :  { %19 = vsyncpa [#allocation11], 0  ;;  %s834_s20 = smov [#allocation4]   ;;  %s65_s24 = sshll.u32 %s958_s5, 4  ;;  %s66_s24 = int_to_ptr.hbm [resolvable:$true] %s65_s24 }
   0x4   :  { %s37_s21 = sshll.u32 %s834_s20, 4  ;;  %s835_s25 = smov 64   ;;  %s38_s21 = int_to_ptr.vmem [resolvable:$true] %s37_s21 }
   0x5   :  { %s836_s26 = smov 4   ;;  %s837_s27 = smov [#allocation7]  }
   0x6   :  { %43 = dma.hbm_to_vmem [thread:$0]  %s36_s19, 128, %s38_s21, [#allocation5], %s835_s25, %s835_s25, %s836_s26  }
   0x7   :  { %s67_s28 = sshll.u32 %s837_s27, 4  ;;  %s25_s30 = sshll.u32 %s953_s0, 4  ;;  %s68_s28 = int_to_ptr.vmem [resolvable:$true] %s67_s28  ;;  %s26_s30 = int_to_ptr.hbm [resolvable:$true] %s25_s30 }
   0x8   :  { %73 = dma.hbm_to_vmem [thread:$0]  %s66_s24, 1024, %s68_s28, [#allocation8], %s835_s25, %s835_s25, %s836_s26  }
   0x9   :  { %s50_s13 = sshll.u32 %s956_s3, 4  ;;  %s838_s14 = smov [#allocation2]   ;;  %s51_s13 = int_to_ptr.hbm [resolvable:$true] %s50_s13 }
   0xa   :  { %s27_s15 = sshll.u32 %s838_s14, 4  ;;  %s839_s16 = smov [#allocation6]   ;;  %s28_s15 = int_to_ptr.vmem [resolvable:$true] %s27_s15 }
   0xb   :  { %30 = dma.hbm_to_vmem [thread:$0]  %s26_s30, 128, %s28_s15, [#allocation3]  }
   0xc   :  { %s52_s17 = sshll.u32 %s839_s16, 4  ;;  %s80_s0 = sshll.u32 %s960_s7, 4  ;;  %s53_s17 = int_to_ptr.vmem [resolvable:$true] %s52_s17  ;;  %s81_s0 = int_to_ptr.hbm [resolvable:$true] %s80_s0 }
   0xd   :  { %58 = dma.hbm_to_vmem [thread:$0]  %s51_s13, 1024, %s53_s17, [#allocation5], %s835_s25, %s835_s25, %s836_s26  }
   0xe   :  { %s95_s3 = sshll.u32 %s962_s9, 4  ;;  %s840_s22 = smov [#allocation9]   ;;  %s96_s3 = int_to_ptr.hbm [resolvable:$true] %s95_s3 }
   0xf   :  { %s82_s23 = sshll.u32 %s840_s22, 4  ;;  %s841_s24 = smov [#allocation10]   ;;  %s83_s23 = int_to_ptr.vmem [resolvable:$true] %s82_s23 }
  0x10   :  { %88 = dma.hbm_to_vmem [thread:$0]  %s81_s0, 1024, %s83_s23, [#allocation8], %s835_s25, %s835_s25, %s836_s26  }
  0x11   :  { %s97_s7 = sshll.u32 %s841_s24, 4  ;;  %s98_s7 = int_to_ptr.vmem [resolvable:$true] %s97_s7 }
  0x12   :  { %103 = dma.hbm_to_vmem [thread:$0]  %s96_s3, 1024, %s98_s7, [#allocation11], %s835_s25, %s835_s25, %s836_s26  }
  0x13   :  { %826 = dma.done.wait [#allocation3], 128  }
  0x14   :  { %827 = vsyncadd [#allocation3], 4294967168 }
  0x15   :  { %828 = dma.done.wait [#allocation5], 1152  }
  0x16   :  { %829 = vsyncadd [#allocation5], 4294966144 }
  0x17   :  { %830 = dma.done.wait [#allocation8], 2048  }
  0x18   :  { %831 = vsyncadd [#allocation8], 4294965248 }
  0x19   :  { %832 = dma.done.wait [#allocation11], 1024  }
  0x1a   :  { %833 = vsyncadd [#allocation11], 4294966272  ;;  %v636_v0 = vld [vmem:[#allocation4] sm:$0xff]  ;;  %v131_v1 = vld [vmem:[#allocation2] sm:$0xff]  ;;  %vm145_vm0 = vcmask 130048  }
  0x1b   :  { %v644_v2 = vld [vmem:[#allocation6 + $0x38] sm:$0xff]  ;;  %v132_v3 = vpack.c.bf16 %v131_v1, %v131_v1  ;;  %156 = vmatpush.bf16.msra.mxu0 %v636_v0  ;;  %v643_v4 = vld [vmem:[#allocation6 + $0x30] sm:$0xff]  ;;  %v642_v5 = vld [vmem:[#allocation6 + $0x28] sm:$0xff] }
  0x1c   :  { %232 = vmatpush.bf16.msra.mxu1 %v644_v2  ;;  %v641_v6 = vld [vmem:[#allocation6 + $0x20] sm:$0xff]  ;;  %v640_v7 = vld [vmem:[#allocation6 + $0x18] sm:$0xff]  ;;  %v639_v8 = vld [vmem:[#allocation6 + $0x10] sm:$0xff] }
  0x1d   :  { %v638_v9 = vld [vmem:[#allocation6 + $0x8] sm:$0xff]  ;;  %v637_v10 = vld [vmem:[#allocation6] sm:$0xff]  ;;  %v652_v11 = vld [vmem:[#allocation7 + $0x38] sm:$0xff] }
  0x1e   :  { %507 = vmatmul.msk.bf16.vlgmr.msra.gmra.mxu0 %vm145_vm0, %v132_v3  ;;  %315 = vmatpush.bf16.msra.mxu2 %v652_v11  ;;  %v651_v12 = vld [vmem:[#allocation7 + $0x30] sm:$0xff]  ;;  %v650_v13 = vld [vmem:[#allocation7 + $0x28] sm:$0xff]  ;;  %v649_v14 = vld [vmem:[#allocation7 + $0x20] sm:$0xff] }
  0x1f   :  { %v648_v15 = vld [vmem:[#allocation7 + $0x18] sm:$0xff]  ;;  %v647_v16 = vld [vmem:[#allocation7 + $0x10] sm:$0xff]  ;;  %v646_v23 = vld [vmem:[#allocation7 + $0x8] sm:$0xff] }
  0x20   :  { %233 = vmatpush.bf16.msra.mxu1 %v643_v4  ;;  %v677_v17 = vld [vmem:[%s955_s2] ss:$0 sm:$0xff]  ;;  %v645_v24 = vld [vmem:[#allocation7] sm:$0xff]  ;;  %v660_v25 = vld [vmem:[#allocation9 + $0x38] sm:$0xff] }
  0x21   :  { %398 = vmatpush.bf16.msra.mxu3 %v660_v25  ;;  %v659_v26 = vld [vmem:[#allocation9 + $0x30] sm:$0xff]  ;;  %v658_v27 = vld [vmem:[#allocation9 + $0x28] sm:$0xff]  ;;  %v657_v28 = vld [vmem:[#allocation9 + $0x20] sm:$0xff] }
  0x22   :  { %316 = vmatpush.bf16.msra.mxu2 %v651_v12  ;;  %v656_v29 = vld [vmem:[#allocation9 + $0x18] sm:$0xff]  ;;  %v655_v30 = vld [vmem:[#allocation9 + $0x10] sm:$0xff]  ;;  %v654_v37 = vld [vmem:[#allocation9 + $0x8] sm:$0xff] }
  0x23   :  { %v678_v31 = vld [vmem:[%s957_s4] ss:$0 sm:$0xff]  ;;  %v653_v38 = vld [vmem:[#allocation9] sm:$0xff]  ;;  %v668_v39 = vld [vmem:[#allocation10 + $0x38] sm:$0xff] }
  0x24   :  { %234 = vmatpush.bf16.msra.mxu1 %v642_v5  ;;  %481 = vmatpush.bf16.msrb.mxu0 %v668_v39  ;;  %v667_v40 = vld [vmem:[#allocation10 + $0x30] sm:$0xff]  ;;  %v666_v41 = vld [vmem:[#allocation10 + $0x28] sm:$0xff]  ;;  %v665_v42 = vld [vmem:[#allocation10 + $0x20] sm:$0xff] }
  0x25   :  { %399 = vmatpush.bf16.msra.mxu3 %v659_v26  ;;  %v664_v43 = vld [vmem:[#allocation10 + $0x18] sm:$0xff]  ;;  %v663_v44 = vld [vmem:[#allocation10 + $0x10] sm:$0xff]  ;;  %v662_v51 = vld [vmem:[#allocation10 + $0x8] sm:$0xff] }
  0x26   :  { %317 = vmatpush.bf16.msra.mxu2 %v650_v13  ;;  %v679_v45 = vld [vmem:[%s959_s6] ss:$0 sm:$0xff]  ;;  %v661_v52 = vld [vmem:[#allocation10] sm:$0xff] }
  0x27   :  { %v680_v53 = vld [vmem:[%s961_s8] ss:$0 sm:$0xff] }
  0x28   :  { %235 = vmatpush.bf16.msra.mxu1 %v641_v6  ;;  %482 = vmatpush.bf16.msrb.mxu0 %v667_v40  ;;  %v681_v59 = vld [vmem:[%s963_s10] ss:$0 sm:$0xff] }
  0x29   :  { %400 = vmatpush.bf16.msra.mxu3 %v658_v27 }
  0x2a   :  { %318 = vmatpush.bf16.msra.mxu2 %v649_v14 }
  0x2c   :  { %236 = vmatpush.bf16.msra.mxu1 %v640_v7  ;;  %483 = vmatpush.bf16.msrb.mxu0 %v666_v41 }
  0x2d   :  { %401 = vmatpush.bf16.msra.mxu3 %v657_v28 }
  0x2e   :  { %319 = vmatpush.bf16.msra.mxu2 %v648_v15 }
  0x30   :  { %237 = vmatpush.bf16.msra.mxu1 %v639_v8  ;;  %484 = vmatpush.bf16.msrb.mxu0 %v665_v42 }
  0x31   :  { %402 = vmatpush.bf16.msra.mxu3 %v656_v29 }
  0x32   :  { %320 = vmatpush.bf16.msra.mxu2 %v647_v16 }
  0x34   :  { %238 = vmatpush.bf16.msra.mxu1 %v638_v9  ;;  %485 = vmatpush.bf16.msrb.mxu0 %v664_v43 }
  0x35   :  { %403 = vmatpush.bf16.msra.mxu3 %v655_v30 }
  0x36   :  { %321 = vmatpush.bf16.msra.mxu2 %v646_v23 }
  0x38   :  { %239 = vmatpush.bf16.msra.mxu1 %v637_v10  ;;  %486 = vmatpush.bf16.msrb.mxu0 %v663_v44 }
  0x39   :  { %404 = vmatpush.bf16.msra.mxu3 %v654_v37 }
  0x3a   :  { %322 = vmatpush.bf16.msra.mxu2 %v645_v24 }
  0x3c   :  { %487 = vmatpush.bf16.msrb.mxu0 %v662_v51 }
  0x3d   :  { %405 = vmatpush.bf16.msra.mxu3 %v653_v38 }
  0x40   :  { %488 = vmatpush.bf16.msrb.mxu0 %v661_v52 }
  0x9b   :  { %v158_v18 = vpop.f32.mrf.mxu0 }
  0x9c   :  { %v159_v19 = vadd.f32 %v677_v17, %v158_v18 }
  0x9e   :  { %v162_v20 = vmax.f32 %v159_v19, 0.0 }
  0xa0   :  { %v163_v21 = vpack.c.bf16 %v162_v20, %v162_v20 }
  0xa2   :  { %240 = vmatmul.bf16.vlgmr.msra.gmra.mxu1 %v163_v21 }
  0xa3   :  { %v160_v22 = vpop.f32.mrf.mxu0 }
 0x11f   :  { %v241_v32 = vpop.f32.mrf.mxu1 }
 0x120   :  { %v242_v33 = vadd.f32 %v678_v31, %v241_v32 }
 0x122   :  { %v245_v34 = vmax.f32 %v242_v33, 0.0 }
 0x124   :  { %v246_v35 = vpack.c.bf16 %v245_v34, %v245_v34 }
 0x126   :  { %323 = vmatmul.bf16.vlgmr.msra.gmra.mxu2 %v246_v35 }
 0x127   :  { %v243_v36 = vpop.f32.mrf.mxu1 }
 0x1a9   :  { %v324_v46 = vpop.f32.mrf.mxu2 }
 0x1aa   :  { %v325_v47 = vadd.f32 %v679_v45, %v324_v46 }
 0x1ac   :  { %v328_v48 = vmax.f32 %v325_v47, 0.0 }
 0x1ae   :  { %v329_v49 = vpack.c.bf16 %v328_v48, %v328_v48 }
 0x1b0   :  { %406 = vmatmul.bf16.vlgmr.msra.gmra.mxu3 %v329_v49 }
 0x1b1   :  { %v326_v50 = vpop.f32.mrf.mxu2 }
 0x233   :  { %v407_v54 = vpop.f32.mrf.mxu3 }
 0x234   :  { %v408_v55 = vadd.f32 %v680_v53, %v407_v54 }
 0x236   :  { %v411_v56 = vmax.f32 %v408_v55, 0.0 }
 0x238   :  { %v412_v57 = vpack.c.bf16 %v411_v56, %v411_v56 }
 0x23a   :  { %489 = vmatmul.bf16.vlgmr.msrb.gmra.mxu0 %v412_v57 }
 0x23b   :  { %v409_v58 = vpop.f32.mrf.mxu3 }
 0x2b7   :  { %v490_v60 = vpop.f32.mrf.mxu0 }
 0x2b8   :  { %v491_v61 = vadd.f32 %v681_v59, %v490_v60 }
 0x2ba   :  { %494 = vst [vmem:[%s964_s11] sm:$0xff] %v491_v61 }
 0x2bf   :  { %v492_v62 = vpop.f32.mrf.mxu0 }
 0x2c0   :  { %499 = vsyncpa [#allocation3], 1 }
 0x2c1   :  { %500 = vsyncpa [#allocation5], 1 }
 0x2c2   :  { %501 = vsyncpa [#allocation8], 1 }
 0x2c3   :  { %502 = vsyncpa [#allocation11], 1 }

</bundles_post_ra>
